<compile_context>
chip_gen: v5e
topology: v5e:2x2
jax: 0.10.0
libtpu: 0.0.40
codegen_flags: <defaults>
</compile_context>

<pallas_src>
import functools

import jax
import jax.numpy as jnp
from jax import lax
from jax.experimental import pallas as pl
from jax.experimental.pallas import tpu as pltpu


# Layers whose flattened row count M is below this run as plain XLA ops (the MXU work is
# nanoseconds while each pallas_call carries ~0.35us fixed dispatch/DMA-setup overhead).
_MIN_PALLAS_ROWS = 128
_BN_EPS = 1e-5

_VMEM_LIMIT = None


def _vmem_limit():
    """Per-generation scoped-VMEM request: ~half of physical VMEM (64 MiB on the
    128-MiB v5e/v6e parts, 32 MiB on 64-MiB v7x), conservative 32 MiB if unknown."""
    global _VMEM_LIMIT
    if _VMEM_LIMIT is None:
        try:
            cap = int(pltpu.get_tpu_info().vmem_capacity_bytes)
        except Exception:
            cap = 64 << 20
        _VMEM_LIMIT = max(32 << 20, min(cap // 2, 96 << 20))
    return _VMEM_LIMIT


def _pick_tile(dim, unit, cap):
    """Largest power-of-two multiple of `unit` dividing `dim`, capped at `cap`.
    Falls back to the full dimension when `dim` is not a multiple of `unit`."""
    if dim % unit != 0:
        return dim
    t = unit
    while t * 2 <= cap and dim % (t * 2) == 0:
        t *= 2
    return t


def _apply_act(x, act):
    if act == "leaky":
        return jnp.where(x > 0, x, 0.2 * x)
    if act == "relu":
        return jnp.maximum(x, 0.0)
    return x


# ----------------------------------------------------------------------------
# Fused "2-row-tap" conv kernel (primary path for Conv and ConvT)
# ----------------------------------------------------------------------------
def _conv_rows_kernel(x_ref, w_ref, b_ref, o_ref, s_ref, *, m_out, n_cols):
    """out[r*C+c, :] = x[r*C+c, :] @ W0 + x[(r+1)*C+c, :] @ W1 + b   (C = n_cols).

    x_ref: (1, m_out + n_cols, K) bf16   resident rows for one batch element
    w_ref: (2, K, TN) bf16               vertical-tap weight slabs
    b_ref: (1, TN) f32
    o_ref: (1, m_out, TN)                bf16 (intermediates) or f32 (final layer)
    s_ref: (1, 2, TN) f32                per-(batch, cout-tile) [sum, sumsq] for BN
    """
    a0 = x_ref[0, 0:m_out, :]
    a1 = x_ref[0, n_cols:n_cols + m_out, :]
    acc = jnp.dot(a0, w_ref[0], preferred_element_type=jnp.float32)
    acc = acc + jnp.dot(a1, w_ref[1], preferred_element_type=jnp.float32)
    acc = acc + b_ref[...]
    o_ref[0] = acc.astype(o_ref.dtype)
    # BN partial stats while the f32 accumulator is live (tiny output; finished in XLA).
    s_ref[0, 0:1, :] = jnp.sum(acc, axis=0, keepdims=True)
    s_ref[0, 1:2, :] = jnp.sum(acc * acc, axis=0, keepdims=True)


def _conv_rows(xh, w2, bias, *, n_cols, out_dtype):
    """Fused 2-row-tap stride-1 conv over row-flattened images.

    xh:  (n, m_out + n_cols, K) — per-image flattened rows of the horizontally
         tap-stacked input (row i, col c at flat index i*n_cols + c; one extra image
         row at the end supplies the vertical halo).
    w2:  (2, K, N) vertical-tap weights;  bias: (N,)
    Returns (y, stats): y (n, m_out, N) out_dtype; stats (2, N) f32 [sum, sumsq].
    """
    n, rows_in, k = xh.shape
    m_out = rows_in - n_cols
    nn = w2.shape[-1]
    xh = xh.astype(jnp.bfloat16)
    w2 = w2.astype(jnp.bfloat16)
    b2 = bias.reshape(1, nn).astype(jnp.float32)
    m_total = n * m_out

    # ---- tiny deep-UNet levels: pure XLA (dispatch overhead >> work) ----
    if m_total < _MIN_PALLAS_ROWS:
        a0 = xh[:, 0:m_out, :]
        a1 = xh[:, n_cols:n_cols + m_out, :]
        dn = (((2,), (0,)), ((), ()))
        y = (lax.dot_general(a0, w2[0], dn, preferred_element_type=jnp.float32)
             + lax.dot_general(a1, w2[1], dn, preferred_element_type=jnp.float32)
             + b2)
        stats = jnp.stack([jnp.sum(y, axis=(0, 1)), jnp.sum(y * y, axis=(0, 1))])
        return y.astype(out_dtype), stats

    tn = _pick_tile(nn, 128, 512)

    # ---- VMEM feasibility of the resident-image block (double-buffered) ----
    x_blk = rows_in * k * 2
    w_blk = 2 * k * tn * 2
    o_blk = m_out * tn * jnp.dtype(out_dtype).itemsize
    acc_tmp = 2 * m_out * tn * 4                    # two live f32 dot results
    need = 2 * (x_blk + w_blk + o_blk) + acc_tmp + 4 * 2 * nn
    limit = _vmem_limit()
    if need > (limit * 3) // 4:
        # Oversized image: fall back to the tiled-matmul kernel (2x tap stack in XLA —
        # still half of v2's 4x stack).
        a = jnp.concatenate([xh[:, 0:m_out, :], xh[:, n_cols:n_cols + m_out, :]],
                            axis=-1).reshape(m_total, 2 * k)
        y = matmul_bias(a, w2.reshape(2 * k, nn), bias, out_dtype=out_dtype)
        yf = y.astype(jnp.float32)
        stats = jnp.stack([jnp.sum(yf, axis=0), jnp.sum(yf * yf, axis=0)])
        return y.reshape(n, m_out, nn), stats

    kernel = functools.partial(_conv_rows_kernel, m_out=m_out, n_cols=n_cols)
    y, stats = pl.pallas_call(
        kernel,
        out_shape=(jax.ShapeDtypeStruct((n, m_out, nn), out_dtype),
                   jax.ShapeDtypeStruct((n, 2, nn), jnp.float32)),
        grid_spec=pltpu.PrefetchScalarGridSpec(
            num_scalar_prefetch=0,
            grid=(n, nn // tn),
            in_specs=[
                pl.BlockSpec((1, rows_in, k), lambda b, j: (b, 0, 0)),
                pl.BlockSpec((2, k, tn), lambda b, j: (0, 0, j)),
                pl.BlockSpec((1, tn), lambda b, j: (0, j)),
            ],
            out_specs=[
                pl.BlockSpec((1, m_out, tn), lambda b, j: (b, 0, j)),
                pl.BlockSpec((1, 2, tn), lambda b, j: (b, 0, j)),
            ],
        ),
        compiler_params=pltpu.CompilerParams(
            # Both axes independent -> v7x can split the batch across its 2 TensorCores.
            dimension_semantics=("parallel", "parallel"),
            vmem_limit_bytes=limit,
        ),
    )(xh, w2, b2)
    return y, jnp.sum(stats, axis=0)


# ----------------------------------------------------------------------------
# Tiled matmul + bias kernel (fallback for images too large to sit in VMEM)
# ----------------------------------------------------------------------------
def _mm_bias_kernel(a_ref, w_ref, b_ref, o_ref, acc_ref):
    @pl.when(pl.program_id(2) == 0)
    def _():
        acc_ref[...] = jnp.zeros_like(acc_ref)

    acc_ref[...] += jnp.dot(a_ref[...], w_ref[...],
                            preferred_element_type=jnp.float32)

    @pl.when(pl.program_id(2) == pl.num_programs(2) - 1)
    def _():
        o_ref[...] = (acc_ref[...] + b_ref[...]).astype(o_ref.dtype)


def matmul_bias(a, w, b, out_dtype=jnp.float32):
    """y = a @ w + b.  a:(M,K), w:(K,N), b:(N,)."""
    m, k = a.shape
    _, n = w.shape
    a = a.astype(jnp.bfloat16)
    w = w.astype(jnp.bfloat16)
    b2 = b.reshape(1, n).astype(jnp.float32)
    if m < _MIN_PALLAS_ROWS:
        return (jnp.dot(a, w, preferred_element_type=jnp.float32) + b2).astype(out_dtype)
    # Pad M/K so _pick_tile never falls back to an oversized full-dimension block.
    mp = -(-m // 8) * 8
    kp = -(-k // 128) * 128
    if mp != m or kp != k:
        a = jnp.pad(a, ((0, mp - m), (0, kp - k)))
        w = jnp.pad(w, ((0, kp - k), (0, 0)))
    tm = _pick_tile(mp, 8, 1024)
    tn = _pick_tile(n, 128, 512)
    tk = _pick_tile(kp, 128, 512)
    out = pl.pallas_call(
        _mm_bias_kernel,
        out_shape=jax.ShapeDtypeStruct((mp, n), out_dtype),
        grid_spec=pltpu.PrefetchScalarGridSpec(
            num_scalar_prefetch=0,
            grid=(mp // tm, n // tn, kp // tk),
            in_specs=[
                pl.BlockSpec((tm, tk), lambda i, j, kk: (i, kk)),
                pl.BlockSpec((tk, tn), lambda i, j, kk: (kk, j)),
                pl.BlockSpec((1, tn), lambda i, j, kk: (0, j)),
            ],
            out_specs=pl.BlockSpec((tm, tn), lambda i, j, kk: (i, j)),
            scratch_shapes=[pltpu.VMEM((tm, tn), jnp.float32)],
        ),
        compiler_params=pltpu.CompilerParams(
            dimension_semantics=("parallel", "parallel", "arbitrary"),
            vmem_limit_bytes=_vmem_limit(),
        ),
    )(a, w, b2)
    return out[:m] if mp != m else out


# ----------------------------------------------------------------------------
# Conv / ConvTranspose (k=4, s=2, p=1) on top of the fused kernel
# ----------------------------------------------------------------------------
def conv2d(x, w, b, act, *, out_dtype=jnp.bfloat16, bn=None):
    """Conv2d(k=4, s=2, p=1), NHWC, optional pre-activation and fused BatchNorm."""
    n, h, wd, cin = x.shape
    cout = w.shape[-1]
    ho, wo = h // 2, wd // 2
    # activation once, on the un-expanded input (exact: the conv zero-pads afterwards)
    xa = _apply_act(x, act).astype(jnp.bfloat16)
    xp = jnp.pad(xa, ((0, 0), (1, 1), (1, 1), (0, 0)))
    # space-to-depth(2): s2d[n,i,j,(dr,dc,ci)] = xp[n, 2i+dr, 2j+dc, ci]
    s2d = (xp.reshape(n, ho + 1, 2, wo + 1, 2, cin)
             .transpose(0, 1, 3, 2, 4, 5)
             .reshape(n, ho + 1, wo + 1, 4 * cin))
    # horizontal-tap stack into lanes (fuses with pad + s2d + activation in XLA)
    xh = jnp.concatenate([s2d[:, :, 0:wo, :], s2d[:, :, 1:wo + 1, :]], axis=-1)
    xh = xh.reshape(n, (ho + 1) * wo, 8 * cin)
    # W2[th, (tw,dr,dc,ci), co] = w[2*th+dr, 2*tw+dc, ci, co]
    w2 = (w.reshape(2, 2, 2, 2, cin, cout)
           .transpose(0, 2, 1, 3, 4, 5)
           .reshape(2, 8 * cin, cout))
    # TODO(synk): cout < 128 (top layer) still stores lane-masked tiles; packing two
    #             output columns per lane row would make those stores unmasked.
    y, stats = _conv_rows(xh, w2, b, n_cols=wo, out_dtype=out_dtype)
    y = y.reshape(n, ho, wo, cout)
    if bn is None:
        return y
    gamma, beta = bn
    m_total = n * ho * wo
    mean = stats[0] / m_total
    var = stats[1] / m_total - mean * mean
    # TODO(synk): E[x^2]-E[x]^2 in f32 can lose precision for very large m_total;
    #             switch to a shifted/two-pass variance if that regime matters.
    scale = gamma * lax.rsqrt(var + _BN_EPS)
    return ((y.astype(jnp.float32) - mean) * scale + beta).astype(jnp.bfloat16)


def conv_transpose2d(x, w_eq, b, act, *, out_dtype=jnp.bfloat16, bn=None):
    """ConvTranspose2d(k=4, s=2, p=1), NHWC, sub-pixel (pixel-shuffle) decomposition.

    w_eq is the 'equivalent forward conv' weight (k, k, Cin, Cout), i.e. the PyTorch
    ConvTranspose2d weight spatially flipped and with (Cin, Cout) transposed.
    TODO(synk): flip/transpose real PyTorch ConvTranspose2d checkpoints accordingly.
    """
    n, h, wd, cin = x.shape
    cout = w_eq.shape[-1]
    xa = _apply_act(x, act).astype(jnp.bfloat16)
    xp = jnp.pad(xa, ((0, 0), (1, 1), (1, 1), (0, 0)))           # (n, h+2, w+2, cin)
    xh = jnp.concatenate([xp[:, :, 0:wd + 1, :], xp[:, :, 1:wd + 2, :]], axis=-1)
    xh = xh.reshape(n, (h + 2) * (wd + 1), 2 * cin)
    # W2[th, (tw,ci), (dr,dc,co)] = w_eq[2*th+dr, 2*tw+dc, ci, co]
    w2 = (w_eq.reshape(2, 2, 2, 2, cin, cout)
              .transpose(0, 2, 4, 1, 3, 5)
              .reshape(2, 2 * cin, 4 * cout))
    z, _ = _conv_rows(xh, w2, jnp.tile(b, 4), n_cols=wd + 1, out_dtype=out_dtype)
    z = z.reshape(n, h + 1, wd + 1, 2, 2, cout)
    # pixel-shuffle interleave: out[:, 2m+dr, 2k+dc, :] = z[:, m+dr, k+dc, dr, dc, :]
    # (pure slice/stack/reshape — XLA fuses it into the consumer's relayout fusion)
    rows = []
    for dr in (0, 1):
        cols = [z[:, dr:dr + h, dc:dc + wd, dr, dc, :] for dc in (0, 1)]
        rows.append(jnp.stack(cols, axis=3))                    # (n, h, w, 2, cout)
    out = jnp.stack(rows, axis=2).reshape(n, 2 * h, 2 * wd, cout)
    if bn is None:
        return out
    gamma, beta = bn
    # TODO(synk): fusing BN stats into the ConvT matmul is inexact (the interleave drops
    #             edge windows), so stats are taken in XLA on the interleaved tensor.
    of = out.astype(jnp.float32)
    mean = jnp.mean(of, axis=(0, 1, 2))
    var = jnp.mean(of * of, axis=(0, 1, 2)) - mean * mean
    scale = gamma * lax.rsqrt(var + _BN_EPS)
    return ((of - mean) * scale + beta).astype(jnp.bfloat16)


# ----------------------------------------------------------------------------
# Parameter init (deterministic) + recursive block apply
# ----------------------------------------------------------------------------
def _init_conv(key, cin, cout, k=4):
    kw_, kb_ = jax.random.split(key)
    fan_in = cin * k * k
    w = jax.random.normal(kw_, (k, k, cin, cout), jnp.float32) / jnp.sqrt(float(fan_in))
    b = 0.01 * jax.random.normal(kb_, (cout,), jnp.float32)
    return {"w": w, "b": b}


def _init_bn(c):
    return {"gamma": jnp.ones((c,), jnp.float32), "beta": jnp.zeros((c,), jnp.float32)}


def init_block(key, in_ch, out_ch, unit_ch, ch_mult, layer_idx=0):
    is_bottom = layer_idx == len(ch_mult) - 1
    is_top = layer_idx == 0
    hidden = unit_ch * ch_mult[layer_idx]
    keys = jax.random.split(key, 8)
    params = {}
    if is_top:
        params["down"] = {"conv": _init_conv(keys[0], in_ch, hidden)}            # 'c'
    elif is_bottom:
        params["down"] = None                                                    # Identity
    else:
        params["down"] = {"conv": _init_conv(keys[0], in_ch, hidden),            # 'acn'
                          "bn": _init_bn(hidden)}
    if is_bottom:
        params["mid"] = {"conv": _init_conv(keys[1], in_ch, out_ch),             # Conv 'ac'
                         "convt": _init_conv(keys[2], out_ch, out_ch),           # ConvT 'acn'
                         "bn": _init_bn(out_ch)}
    else:
        params["mid"] = init_block(keys[3], hidden, hidden, unit_ch, ch_mult, layer_idx + 1)
    if is_top:
        params["up"] = {"convt": _init_conv(keys[4], hidden * 2, out_ch)}        # 'ac'
    elif is_bottom:
        params["up"] = None                                                      # Identity
    else:
        params["up"] = {"convt": _init_conv(keys[4], hidden * 2, out_ch),        # 'acn'
                        "bn": _init_bn(out_ch)}
    return params


def apply_block(params, x, unit_ch, ch_mult, layer_idx=0):
    """x: NHWC. Returns NHWC. Mirrors CurUnetBlock.forward exactly."""
    is_bottom = layer_idx == len(ch_mult) - 1
    is_top = layer_idx == 0
    h = x
    # ---- down ----
    if is_top:
        d = params["down"]
        h = conv2d(h, d["conv"]["w"], d["conv"]["b"], act="none")                    # 'c'
    elif is_bottom:
        pass                                                                         # Identity
    else:
        d = params["down"]
        h = conv2d(h, d["conv"]["w"], d["conv"]["b"], act="leaky",
                   bn=(d["bn"]["gamma"], d["bn"]["beta"]))                           # 'acn'
    # ---- middle ----
    if is_bottom:
        m = params["mid"]
        h = conv2d(h, m["conv"]["w"], m["conv"]["b"], act="leaky")                   # Conv 'ac'
        h = conv_transpose2d(h, m["convt"]["w"], m["convt"]["b"], act="relu",
                             bn=(m["bn"]["gamma"], m["bn"]["beta"]))                 # ConvT 'acn'
    else:
        h = apply_block(params["mid"], h, unit_ch, ch_mult, layer_idx + 1)
    # ---- up ----
    if is_top:
        u = params["up"]
        h = conv_transpose2d(h, u["convt"]["w"], u["convt"]["b"], act="relu",
                             out_dtype=jnp.float32)                                  # 'ac'
    elif is_bottom:
        pass                                                                         # Identity
    else:
        u = params["up"]
        h = conv_transpose2d(h, u["convt"]["w"], u["convt"]["b"], act="relu",
                             bn=(u["bn"]["gamma"], u["bn"]["beta"]))                 # 'acn'
    if is_top:
        return h
    # torch.cat([x, y], dim=1) in NHWC.  The concat fuses into the consumer's
    # pad / space-to-depth / tap-stack relayout that already reads x and h, so it is
    # not an extra standalone HBM pass (this replaces the reviewer's two-input-ConvT
    # suggestion with zero kernel complexity).
    return jnp.concatenate([x.astype(h.dtype), h], axis=-1)


def cur_unet_block(params, x_nchw, unit_ch, ch_mult):
    x = jnp.transpose(x_nchw, (0, 2, 3, 1))             # NCHW -> NHWC
    y = apply_block(params, x, unit_ch, ch_mult, 0)
    return jnp.transpose(y, (0, 3, 1, 2))                # NHWC -> NCHW


# ----------------------------------------------------------------------------
# Pure-XLA reference (same dtype/cast points) for numerical validation
# ----------------------------------------------------------------------------
def _conv2d_ref(x, w, b, act):
    xa = _apply_act(x, act).astype(jnp.bfloat16)
    y = lax.conv_general_dilated(
        xa, w.astype(jnp.bfloat16), window_strides=(2, 2), padding=((1, 1), (1, 1)),
        dimension_numbers=("NHWC", "HWIO", "NHWC"),
        preferred_element_type=jnp.float32)
    return y + b


def _conv_transpose2d_ref(x, w_eq, b, act):
    xa = _apply_act(x, act).astype(jnp.bfloat16)
    y = lax.conv_general_dilated(
        xa, w_eq.astype(jnp.bfloat16), window_strides=(1, 1), padding=((2, 2), (2, 2)),
        lhs_dilation=(2, 2), dimension_numbers=("NHWC", "HWIO", "NHWC"),
        preferred_element_type=jnp.float32)
    return y + b


def _bn_ref(y, gamma, beta):
    yf = y.astype(jnp.float32)
    mean = jnp.mean(yf, axis=(0, 1, 2))
    var = jnp.mean(yf * yf, axis=(0, 1, 2)) - mean * mean
    return (yf - mean) * (gamma * lax.rsqrt(var + _BN_EPS)) + beta


def apply_block_ref(params, x, unit_ch, ch_mult, layer_idx=0):
    is_bottom = layer_idx == len(ch_mult) - 1
    is_top = layer_idx == 0
    h = x
    if is_top:
        d = params["down"]
        h = _conv2d_ref(h, d["conv"]["w"], d["conv"]["b"], "none").astype(jnp.bfloat16)
    elif is_bottom:
        pass
    else:
        d = params["down"]
        h = _conv2d_ref(h, d["conv"]["w"], d["conv"]["b"], "leaky").astype(jnp.bfloat16)
        h = _bn_ref(h, d["bn"]["gamma"], d["bn"]["beta"]).astype(jnp.bfloat16)
    if is_bottom:
        m = params["mid"]
        h = _conv2d_ref(h, m["conv"]["w"], m["conv"]["b"], "leaky").astype(jnp.bfloat16)
        h = _conv_transpose2d_ref(h, m["convt"]["w"], m["convt"]["b"], "relu").astype(jnp.bfloat16)
        h = _bn_ref(h, m["bn"]["gamma"], m["bn"]["beta"]).astype(jnp.bfloat16)
    else:
        h = apply_block_ref(params["mid"], h, unit_ch, ch_mult, layer_idx + 1)
    if is_top:
        u = params["up"]
        h = _conv_transpose2d_ref(h, u["convt"]["w"], u["convt"]["b"], "relu")
    elif is_bottom:
        pass
    else:
        u = params["up"]
        h = _conv_transpose2d_ref(h, u["convt"]["w"], u["convt"]["b"], "relu").astype(jnp.bfloat16)
        h = _bn_ref(h, u["bn"]["gamma"], u["bn"]["beta"]).astype(jnp.bfloat16)
    if is_top:
        return h
    return jnp.concatenate([x.astype(h.dtype), h], axis=-1)


# ----------------------------------------------------------------------------
if __name__ == "__main__":
    key = jax.random.PRNGKey(0)
    k_params, k_x = jax.random.split(key)

    # small config consistent with the module's constructor signature
    in_ch, out_ch = 4, 4
    unit_ch = 8
    ch_mult = (1, 2, 4)          # depth 3: top / middle / bottom
    N, H, W = 2, 16, 16

    params = init_block(k_params, in_ch, out_ch, unit_ch, ch_mult, layer_idx=0)
    x = jax.random.normal(k_x, (N, in_ch, H, W), jnp.float32)    # NCHW like PyTorch

    fwd = jax.jit(functools.partial(cur_unet_block, unit_ch=unit_ch, ch_mult=ch_mult))
    y = fwd(params, x)
    jax.block_until_ready(y)

    assert y.shape == (N, out_ch, H, W), y.shape       # top block returns y (no concat)
    assert bool(jnp.all(jnp.isfinite(y)))

    # numerical reference: pure-XLA lax convolutions with identical cast points
    x_nhwc = jnp.transpose(x, (0, 2, 3, 1))
    y_ref = jnp.transpose(apply_block_ref(params, x_nhwc, unit_ch, ch_mult, 0),
                          (0, 3, 1, 2))
    err = float(jnp.max(jnp.abs(y.astype(jnp.float32) - y_ref.astype(jnp.float32))))
    assert err < 5e-2, f"max |pallas - reference| = {err}"

    print("KERNEL_OK")
</pallas_src>

<mosaic_0001>
module attributes {stable_mosaic.version = 11 : i64} {
  func.func @_conv_rows_kernel(%arg0: i32, %arg1: i32, %arg2: memref<1x72x32xbf16, #tpu.memory_space<vmem>>, %arg3: memref<2x32x8xbf16, #tpu.memory_space<vmem>>, %arg4: memref<1x8xf32, #tpu.memory_space<vmem>>, %arg5: memref<1x64x8xbf16, #tpu.memory_space<vmem>>, %arg6: memref<1x2x8xf32, #tpu.memory_space<vmem>>) attributes {dimension_semantics = [#tpu.dimension_semantics<parallel>, #tpu.dimension_semantics<parallel>], iteration_bounds = array<i64: 2, 1>, scalar_prefetch = 0 : i64, scratch_operands = 0 : i64, tpu.core_type = #tpu.core_type<tc>, window_params = [{transform_indices = @transform_0, window_bounds = array<i64: 1, 72, 32>}, {transform_indices = @transform_1, window_bounds = array<i64: 2, 32, 8>}, {transform_indices = @transform_2, window_bounds = array<i64: 1, 8>}, {transform_indices = @transform_3, window_bounds = array<i64: 1, 64, 8>}, {transform_indices = @transform_4, window_bounds = array<i64: 1, 2, 8>}]} {
    %c0 = arith.constant 0 : index
    %c0_0 = arith.constant 0 : index
    %c0_1 = arith.constant 0 : index
    %0 = vector.load %arg2[%c0, %c0_0, %c0_1] : memref<1x72x32xbf16, #tpu.memory_space<vmem>>, vector<1x64x32xbf16>
    %1 = vector.shape_cast %0 : vector<1x64x32xbf16> to vector<64x32xbf16>
    %c0_2 = arith.constant 0 : index
    %c8 = arith.constant 8 : index
    %c0_3 = arith.constant 0 : index
    %2 = vector.load %arg2[%c0_2, %c8, %c0_3] : memref<1x72x32xbf16, #tpu.memory_space<vmem>>, vector<1x64x32xbf16>
    %3 = vector.shape_cast %2 : vector<1x64x32xbf16> to vector<64x32xbf16>
    %c0_4 = arith.constant 0 : index
    %c0_5 = arith.constant 0 : index
    %c0_6 = arith.constant 0 : index
    %4 = vector.load %arg3[%c0_4, %c0_5, %c0_6] : memref<2x32x8xbf16, #tpu.memory_space<vmem>>, vector<1x32x8xbf16>
    %5 = vector.shape_cast %4 : vector<1x32x8xbf16> to vector<32x8xbf16>
    %cst = arith.constant dense<0.000000e+00> : vector<64x8xf32>
    %6 = tpu.matmul %1, %5, %cst {dimension_numbers = #tpu.dot_dimension_numbers<[1], [0], [0], [1], [0, 0, 1, 1], [], []>} : vector<64x32xbf16>, vector<32x8xbf16>, vector<64x8xf32> -> vector<64x8xf32>
    %c1 = arith.constant 1 : index
    %c0_7 = arith.constant 0 : index
    %c0_8 = arith.constant 0 : index
    %7 = vector.load %arg3[%c1, %c0_7, %c0_8] : memref<2x32x8xbf16, #tpu.memory_space<vmem>>, vector<1x32x8xbf16>
    %8 = vector.shape_cast %7 : vector<1x32x8xbf16> to vector<32x8xbf16>
    %cst_9 = arith.constant dense<0.000000e+00> : vector<64x8xf32>
    %9 = tpu.matmul %3, %8, %cst_9 {dimension_numbers = #tpu.dot_dimension_numbers<[1], [0], [0], [1], [0, 0, 1, 1], [], []>} : vector<64x32xbf16>, vector<32x8xbf16>, vector<64x8xf32> -> vector<64x8xf32>
    %10 = arith.addf %6, %9 : vector<64x8xf32>
    %c0_10 = arith.constant 0 : index
    %c0_11 = arith.constant 0 : index
    %11 = vector.load %arg4[%c0_10, %c0_11] : memref<1x8xf32, #tpu.memory_space<vmem>>, vector<1x8xf32>
    %12 = vector.broadcast %11 : vector<1x8xf32> to vector<64x8xf32>
    %13 = arith.addf %10, %12 : vector<64x8xf32>
    %14 = arith.truncf %13 : vector<64x8xf32> to vector<64x8xbf16>
    %c0_12 = arith.constant 0 : index
    %c0_13 = arith.constant 0 : index
    %c0_14 = arith.constant 0 : index
    %15 = vector.load %arg5[%c0_12, %c0_13, %c0_14] : memref<1x64x8xbf16, #tpu.memory_space<vmem>>, vector<1x64x8xbf16>
    %16 = vector.shape_cast %15 : vector<1x64x8xbf16> to vector<64x8xbf16>
    %17 = vector.shape_cast %14 : vector<64x8xbf16> to vector<1x64x8xbf16>
    tpu.vector_store %arg5[%c0_12, %c0_13, %c0_14], %17 {strides = array<i32>} : memref<1x64x8xbf16, #tpu.memory_space<vmem>>, vector<1x64x8xbf16>,
    %cst_15 = arith.constant dense<0.000000e+00> : vector<8xf32>
    %18 = vector.multi_reduction <add>, %13, %cst_15 [0] : vector<64x8xf32> to vector<8xf32>
    %19 = vector.shape_cast %18 : vector<8xf32> to vector<1x8xf32>
    %c0_16 = arith.constant 0 : index
    %c0_17 = arith.constant 0 : index
    %c0_18 = arith.constant 0 : index
    %20 = vector.load %arg6[%c0_16, %c0_17, %c0_18] : memref<1x2x8xf32, #tpu.memory_space<vmem>>, vector<1x1x8xf32>
    %21 = vector.shape_cast %20 : vector<1x1x8xf32> to vector<1x8xf32>
    %22 = vector.shape_cast %19 : vector<1x8xf32> to vector<1x1x8xf32>
    tpu.vector_store %arg6[%c0_16, %c0_17, %c0_18], %22 {strides = array<i32>} : memref<1x2x8xf32, #tpu.memory_space<vmem>>, vector<1x1x8xf32>,
    %23 = arith.mulf %13, %13 : vector<64x8xf32>
    %cst_19 = arith.constant dense<0.000000e+00> : vector<8xf32>
    %24 = vector.multi_reduction <add>, %23, %cst_19 [0] : vector<64x8xf32> to vector<8xf32>
    %25 = vector.shape_cast %24 : vector<8xf32> to vector<1x8xf32>
    %c0_20 = arith.constant 0 : index
    %c1_21 = arith.constant 1 : index
    %c0_22 = arith.constant 0 : index
    %26 = vector.load %arg6[%c0_20, %c1_21, %c0_22] : memref<1x2x8xf32, #tpu.memory_space<vmem>>, vector<1x1x8xf32>
    %27 = vector.shape_cast %26 : vector<1x1x8xf32> to vector<1x8xf32>
    %28 = vector.shape_cast %25 : vector<1x8xf32> to vector<1x1x8xf32>
    tpu.vector_store %arg6[%c0_20, %c1_21, %c0_22], %28 {strides = array<i32>} : memref<1x2x8xf32, #tpu.memory_space<vmem>>, vector<1x1x8xf32>,
    return
  }
  func.func @transform_0(%arg0: i32, %arg1: i32) -> (i32, i32, i32) {
    %c0_i32 = arith.constant 0 : i32
    %c0_i32_0 = arith.constant 0 : i32
    %c0_i32_1 = arith.constant 0 : i32
    return %arg0, %c0_i32, %c0_i32_0 : i32, i32, i32
  }
  func.func @transform_1(%arg0: i32, %arg1: i32) -> (i32, i32, i32) {
    %c0_i32 = arith.constant 0 : i32
    %c0_i32_0 = arith.constant 0 : i32
    %c0_i32_1 = arith.constant 0 : i32
    return %c0_i32, %c0_i32_0, %arg1 : i32, i32, i32
  }
  func.func @transform_2(%arg0: i32, %arg1: i32) -> (i32, i32) {
    %c0_i32 = arith.constant 0 : i32
    %c0_i32_0 = arith.constant 0 : i32
    return %c0_i32, %arg1 : i32, i32
  }
  func.func @transform_3(%arg0: i32, %arg1: i32) -> (i32, i32, i32) {
    %c0_i32 = arith.constant 0 : i32
    %c0_i32_0 = arith.constant 0 : i32
    return %arg0, %c0_i32, %arg1 : i32, i32, i32
  }
  func.func @transform_4(%arg0: i32, %arg1: i32) -> (i32, i32, i32) {
    %c0_i32 = arith.constant 0 : i32
    %c0_i32_0 = arith.constant 0 : i32
    return %arg0, %c0_i32, %arg1 : i32, i32, i32
  }
}

module attributes {stable_mosaic.version = 11 : i64} {
  func.func @_conv_rows_kernel(%arg0: i32, %arg1: i32, %arg2: memref<1x90x32xbf16, #tpu.memory_space<vmem>>, %arg3: memref<2x32x16xbf16, #tpu.memory_space<vmem>>, %arg4: memref<1x16xf32, #tpu.memory_space<vmem>>, %arg5: memref<1x81x16xf32, #tpu.memory_space<vmem>>, %arg6: memref<1x2x16xf32, #tpu.memory_space<vmem>>) attributes {dimension_semantics = [#tpu.dimension_semantics<parallel>, #tpu.dimension_semantics<parallel>], iteration_bounds = array<i64: 2, 1>, scalar_prefetch = 0 : i64, scratch_operands = 0 : i64, tpu.core_type = #tpu.core_type<tc>, window_params = [{transform_indices = @transform_0, window_bounds = array<i64: 1, 90, 32>}, {transform_indices = @transform_1, window_bounds = array<i64: 2, 32, 16>}, {transform_indices = @transform_2, window_bounds = array<i64: 1, 16>}, {transform_indices = @transform_3, window_bounds = array<i64: 1, 81, 16>}, {transform_indices = @transform_4, window_bounds = array<i64: 1, 2, 16>}]} {
    %c0 = arith.constant 0 : index
    %c0_0 = arith.constant 0 : index
    %c0_1 = arith.constant 0 : index
    %0 = vector.load %arg2[%c0, %c0_0, %c0_1] : memref<1x90x32xbf16, #tpu.memory_space<vmem>>, vector<1x81x32xbf16>
    %1 = vector.shape_cast %0 : vector<1x81x32xbf16> to vector<81x32xbf16>
    %c0_2 = arith.constant 0 : index
    %c9 = arith.constant 9 : index
    %c0_3 = arith.constant 0 : index
    %2 = vector.load %arg2[%c0_2, %c9, %c0_3] : memref<1x90x32xbf16, #tpu.memory_space<vmem>>, vector<1x81x32xbf16>
    %3 = vector.shape_cast %2 : vector<1x81x32xbf16> to vector<81x32xbf16>
    %c0_4 = arith.constant 0 : index
    %c0_5 = arith.constant 0 : index
    %c0_6 = arith.constant 0 : index
    %4 = vector.load %arg3[%c0_4, %c0_5, %c0_6] : memref<2x32x16xbf16, #tpu.memory_space<vmem>>, vector<1x32x16xbf16>
    %5 = vector.shape_cast %4 : vector<1x32x16xbf16> to vector<32x16xbf16>
    %cst = arith.constant dense<0.000000e+00> : vector<81x16xf32>
    %6 = tpu.matmul %1, %5, %cst {dimension_numbers = #tpu.dot_dimension_numbers<[1], [0], [0], [1], [0, 0, 1, 1], [], []>} : vector<81x32xbf16>, vector<32x16xbf16>, vector<81x16xf32> -> vector<81x16xf32>
    %c1 = arith.constant 1 : index
    %c0_7 = arith.constant 0 : index
    %c0_8 = arith.constant 0 : index
    %7 = vector.load %arg3[%c1, %c0_7, %c0_8] : memref<2x32x16xbf16, #tpu.memory_space<vmem>>, vector<1x32x16xbf16>
    %8 = vector.shape_cast %7 : vector<1x32x16xbf16> to vector<32x16xbf16>
    %cst_9 = arith.constant dense<0.000000e+00> : vector<81x16xf32>
    %9 = tpu.matmul %3, %8, %cst_9 {dimension_numbers = #tpu.dot_dimension_numbers<[1], [0], [0], [1], [0, 0, 1, 1], [], []>} : vector<81x32xbf16>, vector<32x16xbf16>, vector<81x16xf32> -> vector<81x16xf32>
    %10 = arith.addf %6, %9 : vector<81x16xf32>
    %c0_10 = arith.constant 0 : index
    %c0_11 = arith.constant 0 : index
    %11 = vector.load %arg4[%c0_10, %c0_11] : memref<1x16xf32, #tpu.memory_space<vmem>>, vector<1x16xf32>
    %12 = vector.broadcast %11 : vector<1x16xf32> to vector<81x16xf32>
    %13 = arith.addf %10, %12 : vector<81x16xf32>
    %c0_12 = arith.constant 0 : index
    %c0_13 = arith.constant 0 : index
    %c0_14 = arith.constant 0 : index
    %14 = vector.load %arg5[%c0_12, %c0_13, %c0_14] : memref<1x81x16xf32, #tpu.memory_space<vmem>>, vector<1x81x16xf32>
    %15 = vector.shape_cast %14 : vector<1x81x16xf32> to vector<81x16xf32>
    %16 = vector.shape_cast %13 : vector<81x16xf32> to vector<1x81x16xf32>
    tpu.vector_store %arg5[%c0_12, %c0_13, %c0_14], %16 {strides = array<i32>} : memref<1x81x16xf32, #tpu.memory_space<vmem>>, vector<1x81x16xf32>,
    %cst_15 = arith.constant dense<0.000000e+00> : vector<16xf32>
    %17 = vector.multi_reduction <add>, %13, %cst_15 [0] : vector<81x16xf32> to vector<16xf32>
    %18 = vector.shape_cast %17 : vector<16xf32> to vector<1x16xf32>
    %c0_16 = arith.constant 0 : index
    %c0_17 = arith.constant 0 : index
    %c0_18 = arith.constant 0 : index
    %19 = vector.load %arg6[%c0_16, %c0_17, %c0_18] : memref<1x2x16xf32, #tpu.memory_space<vmem>>, vector<1x1x16xf32>
    %20 = vector.shape_cast %19 : vector<1x1x16xf32> to vector<1x16xf32>
    %21 = vector.shape_cast %18 : vector<1x16xf32> to vector<1x1x16xf32>
    tpu.vector_store %arg6[%c0_16, %c0_17, %c0_18], %21 {strides = array<i32>} : memref<1x2x16xf32, #tpu.memory_space<vmem>>, vector<1x1x16xf32>,
    %22 = arith.mulf %13, %13 : vector<81x16xf32>
    %cst_19 = arith.constant dense<0.000000e+00> : vector<16xf32>
    %23 = vector.multi_reduction <add>, %22, %cst_19 [0] : vector<81x16xf32> to vector<16xf32>
    %24 = vector.shape_cast %23 : vector<16xf32> to vector<1x16xf32>
    %c0_20 = arith.constant 0 : index
    %c1_21 = arith.constant 1 : index
    %c0_22 = arith.constant 0 : index
    %25 = vector.load %arg6[%c0_20, %c1_21, %c0_22] : memref<1x2x16xf32, #tpu.memory_space<vmem>>, vector<1x1x16xf32>
    %26 = vector.shape_cast %25 : vector<1x1x16xf32> to vector<1x16xf32>
    %27 = vector.shape_cast %24 : vector<1x16xf32> to vector<1x1x16xf32>
    tpu.vector_store %arg6[%c0_20, %c1_21, %c0_22], %27 {strides = array<i32>} : memref<1x2x16xf32, #tpu.memory_space<vmem>>, vector<1x1x16xf32>,
    return
  }
  func.func @transform_0(%arg0: i32, %arg1: i32) -> (i32, i32, i32) {
    %c0_i32 = arith.constant 0 : i32
    %c0_i32_0 = arith.constant 0 : i32
    %c0_i32_1 = arith.constant 0 : i32
    return %arg0, %c0_i32, %c0_i32_0 : i32, i32, i32
  }
  func.func @transform_1(%arg0: i32, %arg1: i32) -> (i32, i32, i32) {
    %c0_i32 = arith.constant 0 : i32
    %c0_i32_0 = arith.constant 0 : i32
    %c0_i32_1 = arith.constant 0 : i32
    return %c0_i32, %c0_i32_0, %arg1 : i32, i32, i32
  }
  func.func @transform_2(%arg0: i32, %arg1: i32) -> (i32, i32) {
    %c0_i32 = arith.constant 0 : i32
    %c0_i32_0 = arith.constant 0 : i32
    return %c0_i32, %arg1 : i32, i32
  }
  func.func @transform_3(%arg0: i32, %arg1: i32) -> (i32, i32, i32) {
    %c0_i32 = arith.constant 0 : i32
    %c0_i32_0 = arith.constant 0 : i32
    return %arg0, %c0_i32, %arg1 : i32, i32, i32
  }
  func.func @transform_4(%arg0: i32, %arg1: i32) -> (i32, i32, i32) {
    %c0_i32 = arith.constant 0 : i32
    %c0_i32_0 = arith.constant 0 : i32
    return %arg0, %c0_i32, %arg1 : i32, i32, i32
  }
}

</mosaic_0001>

<bundles_post_ra>
// kernel: cur_unet_block.2
= control target key start
LH: loop header
LB: loop body
LE: loop exit
PB: predicated region body
PF: predicated region fallthrough
CT: control target
= control target key end

     0   :  { %10 = vsyncpa [#allocation3], 0  ;;  %s1088_s0 = inlined_call_operand.vmem [shape: bf16[2,72,32], index: 0, kind: input, shape index: {}]   ;;  %s1089_s1 = inlined_call_operand.vmem [shape: bf16[2,32,8], index: 1, kind: input, shape index: {}]   ;;  %s1090_s2 = inlined_call_operand.vmem [shape: f32[1,8], index: 2, kind: input, shape index: {}]   ;;  %s1091_s3 = inlined_call_operand.vmem [shape: bf16[2,64,8], index: 3, kind: output, shape index: {0}]   ;;  %s1092_s4 = inlined_call_operand.hbm [shape: f32[2,2,8], index: 4, kind: output, shape index: {1}]  }
   0x1   :  { %12 = vsyncpa [#allocation3 + $0x1], 0  ;;  %s917_s15 = smov 0   ;;  %s919_s16 = smov 0  }
   0x2   :  { %s921_s17 = smov 0   ;;  %s923_s18 = smov 0  }
   0x3   :  { %s925_s19 = smov 0   ;;  %s927_s20 = smov 0  }
   0x4 LB: > { %s656_s21 = sadd.s32 4294967295, %s890_s20   ;;  %s657_s22 = sadd.s32 4294967294, %s890_s20   ;;  %s890_s20 = sphi %s927_s20, %s18_s20   ;;  %s886_s19 = sphi %s925_s19, %s1099_s19   ;;  %s882_s18 = sphi %s923_s18, %s1098_s18   ;;  %s878_s17 = sphi %s921_s17, %s1097_s17   ;;  %s874_s16 = sphi %s919_s16, %s1096_s16   ;;  %s870_s15 = sphi %s917_s15, %s1095_s15  }
   0x5   : > { %s30_s23 = sadd.s32 1, %s886_s19  ;;  %s145_s24 = sadd.s32 1, %s878_s17 }
   0x6   : > { %p32_p0 = scmp.ge.s32.totalorder %s30_s23, 2  ;;  %p155_p1 = scmp.ne.s32.totalorder %s878_s17, %s874_s16 }
   0x7   : > { %p156_p2 = scmp.eq.s32.totalorder %s656_s21, 1  ;;  %p161_p3 = scmp.ne.s32.totalorder %s874_s16, %s870_s15 }
   0x8   : > { %s1101_s23 = smov (%p32_p0, %s30_s23), 0  ;;  %p162_p5 = scmp.eq.s32.totalorder %s657_s22, 1 }
   0x9   : > { %p957_p4 = por %p156_p2, %p155_p1  ;;  %s140_s26 = ssub.s32 %s886_s19, %s1101_s23 }
   0xa   : > { %p662_p6 = scmp.ge.s32.totalorder %s890_s20, 1  ;;  %p143_p7 = scmp.eq.s32.totalorder %s140_s26, 0 }
   0xb   : > { %p964_p8 = por %p162_p5, %p161_p3  ;;  %p201_p9 = scmp.lt.s32.totalorder %s890_s20, 3 }
   0xc   : > { %s970_s28 = scalar_select %p143_p7, %s878_s17, %s145_s24  }
   0xd   : > { %p202_p10 = pnand %p662_p6, %p201_p9 }
   0xe   : > { %p242_p11 = scmp.lt.s32.totalorder (!%p202_p10), %s882_s18, 1  ;;  %s239_s6 = sand.u32 (!%p202_p10), 1, %s874_s16  }
   0xf   : > { %205 = sbr.rel (%p202_p10) target bundleno = 211 (0xd3), region = 32  ;;  %s663_s7 = sshll.u32 (!%p202_p10), %s239_s6, 1 }
  0x10   : > { %s696_s8 = sshll.u32 (!%p202_p10), %s882_s18, 1  ;;  %s832_s29 = scalar_lea.hbm (!%p202_p10), %s1092_s4, 4 }
  0x11   : > { %s520_s11 = scalar_lea.hbm (!%p202_p10), %s1092_s4, %s696_s8 }
  0x12   : > { %s524_s14 = sshll.u32 (!%p202_p10), %s520_s11, 4  ;;  %s525_s14 = int_to_ptr.hbm [resolvable:$true] %s524_s14 }
  0x14   : > { %v703_v0 = vld [vmem:[%s1089_s1 + $0x18] sm:$0xff]  ;;  %v701_v1 = vld [vmem:[%s1089_s1 + $0x8] sm:$0xff]  ;;  %v702_v2 = vld [vmem:[%s1089_s1 + $0x10] sm:$0xff]  ;;  %s983_s9 = scalar_select %p242_p11, %s882_s18, 1  ;;  %vm313_vm0 = vcmask 261120   ;;  %vm434_vm1 = vcmask 60416  }
  0x15   : > { %332 = vmatpush.bf16.msra.mxu0 %v703_v0  ;;  %743 = vmatpush.bf16.msra.mxu2 %v703_v0  ;;  %v700_v3 = vld [vmem:[%s1089_s1] sm:$0xff]  ;;  %vm443_vm2 = vcmask 64512   ;;  %vm465_vm3 = vcmask 57344   ;;  %s506_s18 = scalar_lea.sflag [#allocation3], %s239_s6 }
  0x16   : > { %391 = vmatpush.bf16.msra.mxu1 %v701_v1  ;;  %745 = vmatpush.bf16.msra.mxu3 %v701_v1  ;;  %s755_s12 = smul.u32 36, %s983_s9  ;;  %v1003_v13 = vld [vmem:[%s1090_s2] ss:$0 sm:$0xff]  ;;  %s699_s26 = sshll.u32 %s983_s9, 5 }
  0x17   : > { %s1010_s5 = scalar_lea.vmem %s1091_s3, %s699_s26 }
  0x18   : > { %s246_s21 = scalar_lea.vmem %s1088_s0, %s755_s12  ;;  %s241_s12 = scalar_lea.vmem [#allocation2], %s663_s7 }
  0x19   : > { %333 = vmatpush.bf16.msra.mxu0 %v702_v2  ;;  %744 = vmatpush.bf16.msra.mxu2 %v702_v2  ;;  %v749_v4 = vld [vmem:[%s246_s21 + $0x4] sm:$0xff]   ;;  %v753_v5 = vld [vmem:[%s246_s21 + $0x14] sm:$0xff]   ;;  %v751_v8 = vld [vmem:[%s246_s21 + $0xc] sm:$0xff]   ;;  %s522_s13 = sshll.u32 %s241_s12, 4  ;;  %s523_s13 = int_to_ptr.vmem [resolvable:$true] %s522_s13 }
  0x1a   : > { %392 = vmatpush.bf16.msra.mxu1 %v700_v3  ;;  %746 = vmatpush.bf16.msra.mxu3 %v700_v3  ;;  %v705_v6 = vld [vmem:[%s246_s21] sm:$0xff]   ;;  %v721_v7 = vld [vmem:[%s246_s21 + $0x10] sm:$0xff]   ;;  %v720_v10 = vld [vmem:[%s246_s21 + $0x8] sm:$0xff]  }
  0x1b   : > { %v754_v9 = vld [vmem:[%s246_s21 + $0x1c] sm:$0xff] }
  0x1c   : > { %679 = vmatmul.msk.bf16.vlgmr.msra.gmra.mxu0 %vm313_vm0, %v749_v4  ;;  %681 = vmatmul.msk.bf16.vlgmr.msra.gmra.mxu2 %vm313_vm0, %v753_v5  ;;  %v722_v11 = vld [vmem:[%s246_s21 + $0x18] sm:$0xff]   ;;  %s826_s21 = sshra.s32 %s525_s14, 4  ;;  %s827_s21 = int_to_ptr.hbm [resolvable:$true] %s826_s21 }
  0x1d   : > { %691 = vmatmul.msk.bf16.vlgmr.msra.gmra.mxu1 %vm313_vm0, %v705_v6  ;;  %693 = vmatmul.msk.bf16.vlgmr.msra.gmra.mxu3 %vm313_vm0, %v721_v7  ;;  %s828_s22 = scalar_lea.hbm %s827_s21, 2  ;;  %p833_p1 = scmp.lt.s32.totalorder %s827_s21, %s1092_s4 }
  0x1e   : > { %p829_p12 = scmp.ne.s32.totalorder %s827_s21, %s828_s22  ;;  %p834_p2 = scmp.lt.s32.totalorder %s832_s29, %s828_s22 }
  0x20   : > { %p830_p13 = pnand %p829_p12, %p957_p4  ;;  %p835_p3 = por %p834_p2, %p833_p1 }
  0x22   : > { %p831_p0 = pneg %p830_p13 }
  0x24   : > { %p836_p5 = pnand %p835_p3, %p831_p0 }
  0x2c   : > { %680 = vmatmul.msk.bf16.gmra.mxu0 %vm313_vm0, %v751_v8  ;;  %682 = vmatmul.msk.bf16.gmra.mxu2 %vm313_vm0, %v754_v9 }
  0x2d   : > { %692 = vmatmul.msk.bf16.gmra.mxu1 %vm313_vm0, %v720_v10  ;;  %694 = vmatmul.msk.bf16.gmra.mxu3 %vm313_vm0, %v722_v11 }
  0x99   : > { %v335_v12 = vpop.f32.mrf.mxu0 }
  0x9a   : > { %v394_v14 = vpop.f32.mrf.mxu1 }
  0x9b   : > { %v395_v15 = vadd.f32 %v394_v14, %v335_v12 }
  0x9d   : > { %v418_v16 = vadd.f32 %v1003_v13, %v395_v15 }
  0x9f   : > { %v426_v17 = vpack.c.bf16 %v418_v16, %v418_v16  ;;  %v345_v18 = vpop.f32.mrf.mxu2  ;;  %v467_v41 = vmul.f32 %v418_v16, %v418_v16  ;;  %v444_v46 = vsel %vm443_vm2, %v418_v16, 0.0 }
  0xa0   : > { %v404_v19 = vpop.f32.mrf.mxu3 }
  0xa1   : > { %435 = vst.msk [vmem:[%s1010_s5] sm:$0xf] %vm434_vm1, %v426_v17  ;;  %v405_v20 = vadd.f32 %v404_v19, %v345_v18  ;;  %v337_v21 = vpop.f32.mrf.mxu0  ;;  %v475_v53 = vsel %vm443_vm2, %v467_v41, 0.0 }
  0xa2   : > { %v396_v22 = vpop.f32.mrf.mxu1 }
  0xa3   : > { %v422_v23 = vadd.f32 %v1003_v13, %v405_v20  ;;  %v397_v24 = vadd.f32 %v396_v22, %v337_v21 }
  0xa5   : > { %v430_v25 = vpack.c.bf16 %v422_v23, %v422_v23  ;;  %v419_v26 = vadd.f32 %v1003_v13, %v397_v24  ;;  %v471_v59 = vmul.f32 %v422_v23, %v422_v23  ;;  %v451_v3 = vsel %vm443_vm2, %v422_v23, 0.0 }
  0xa7   : > { %439 = vst.msk [vmem:[%s1010_s5 + $0x10] sm:$0xf] %vm434_vm1, %v430_v25  ;;  %v427_v27 = vpack.c.bf16 %v419_v26, %v419_v26  ;;  %v347_v28 = vpop.f32.mrf.mxu2  ;;  %v468_v37 = vmul.f32 %v419_v26, %v419_v26  ;;  %v445_v42 = vsel %vm443_vm2, %v419_v26, 0.0  ;;  %v482_v9 = vsel %vm443_vm2, %v471_v59, 0.0 }
  0xa8   : > { %v406_v29 = vpop.f32.mrf.mxu3  ;;  %v446_v52 = vadd.f32 %v445_v42, %v444_v46 }
  0xa9   : > { %436 = vst.msk [vmem:[%s1010_s5 + $0x4] sm:$0xf] %vm434_vm1, %v427_v27  ;;  %v407_v30 = vadd.f32 %v406_v29, %v347_v28  ;;  %v340_v31 = vpop.f32.mrf.mxu0  ;;  %v476_v48 = vsel %vm443_vm2, %v468_v37, 0.0 }
  0xaa   : > { %v399_v32 = vpop.f32.mrf.mxu1  ;;  %v477_v57 = vadd.f32 %v476_v48, %v475_v53 }
  0xab   : > { %v423_v33 = vadd.f32 %v1003_v13, %v407_v30  ;;  %v400_v34 = vadd.f32 %v399_v32, %v340_v31 }
  0xad   : > { %v431_v35 = vpack.c.bf16 %v423_v33, %v423_v33  ;;  %v420_v36 = vadd.f32 %v1003_v13, %v400_v34  ;;  %v472_v4 = vmul.f32 %v423_v33, %v423_v33  ;;  %v453_v10 = vsel %vm443_vm2, %v423_v33, 0.0 }
  0xaf   : > { %440 = vst.msk [vmem:[%s1010_s5 + $0x14] sm:$0xf] %vm434_vm1, %v431_v35  ;;  %v428_v38 = vpack.c.bf16 %v420_v36, %v420_v36  ;;  %v350_v39 = vpop.f32.mrf.mxu2  ;;  %v469_v43 = vmul.f32 %v420_v36, %v420_v36  ;;  %v447_v49 = vsel %vm443_vm2, %v420_v36, 0.0  ;;  %v484_v16 = vsel %vm443_vm2, %v472_v4, 0.0 }
  0xb0   : > { %v409_v40 = vpop.f32.mrf.mxu3  ;;  %v448_v58 = vadd.f32 %v447_v49, %v446_v52 }
  0xb1   : > { %437 = vst.msk [vmem:[%s1010_s5 + $0x8] sm:$0xf] %vm434_vm1, %v428_v38  ;;  %v410_v44 = vadd.f32 %v409_v40, %v350_v39  ;;  %v342_v45 = vpop.f32.mrf.mxu0  ;;  %v478_v54 = vsel %vm443_vm2, %v469_v43, 0.0 }
  0xb2   : > { %v401_v47 = vpop.f32.mrf.mxu1  ;;  %v479_v0 = vadd.f32 %v478_v54, %v477_v57 }
  0xb3   : > { %v424_v50 = vadd.f32 %v1003_v13, %v410_v44  ;;  %v402_v51 = vadd.f32 %v401_v47, %v342_v45 }
  0xb5   : > { %v432_v55 = vpack.c.bf16 %v424_v50, %v424_v50  ;;  %v421_v56 = vadd.f32 %v1003_v13, %v402_v51  ;;  %v473_v11 = vmul.f32 %v424_v50, %v424_v50  ;;  %v455_v17 = vsel %vm443_vm2, %v424_v50, 0.0 }
  0xb7   : > { %441 = vst.msk [vmem:[%s1010_s5 + $0x18] sm:$0xf] %vm434_vm1, %v432_v55  ;;  %v429_v60 = vpack.c.bf16 %v421_v56, %v421_v56  ;;  %v449_v61 = vsel %vm443_vm2, %v421_v56, 0.0  ;;  %v470_v62 = vmul.f32 %v421_v56, %v421_v56  ;;  %v352_v63 = vpop.f32.mrf.mxu2  ;;  %v486_v22 = vsel %vm443_vm2, %v473_v11, 0.0 }
  0xb8   : > { %v450_v1 = vadd.f32 %v449_v61, %v448_v58  ;;  %v411_v2 = vpop.f32.mrf.mxu3 }
  0xb9   : > { %438 = vst.msk [vmem:[%s1010_s5 + $0xc] sm:$0xf] %vm434_vm1, %v429_v60  ;;  %v480_v5 = vsel %vm443_vm2, %v470_v62, 0.0  ;;  %v412_v6 = vadd.f32 %v411_v2, %v352_v63 }
  0xba   : > { %v452_v7 = vadd.f32 %v451_v3, %v450_v1  ;;  %v481_v8 = vadd.f32 %v480_v5, %v479_v0 }
  0xbb   : > { %v425_v12 = vadd.f32 %v1003_v13, %v412_v6 }
  0xbc   : > { %v483_v14 = vadd.f32 %v482_v9, %v481_v8  ;;  %v454_v15 = vadd.f32 %v453_v10, %v452_v7 }
  0xbd   : > { %v433_v18 = vpack.c.bf16 %v425_v12, %v425_v12  ;;  %v474_v19 = vmul.f32 %v425_v12, %v425_v12  ;;  %v457_v23 = vsel %vm443_vm2, %v425_v12, 0.0 }
  0xbe   : > { %v456_v20 = vadd.f32 %v455_v17, %v454_v15  ;;  %v485_v21 = vadd.f32 %v484_v16, %v483_v14 }
  0xbf   : > { %442 = vst.msk [vmem:[%s1010_s5 + $0x1c] sm:$0xf] %vm434_vm1, %v433_v18  ;;  %v488_v25 = vsel %vm443_vm2, %v474_v19, 0.0 }
  0xc0   : > { %v458_v24 = vadd.f32 %v457_v23, %v456_v20  ;;  %v487_v13 = vadd.f32 %v486_v22, %v485_v21 }
  0xc2   : > { %v459_v26 = vrot.slane %v458_v24, 4  ;;  %v489_v27 = vadd.f32 %v488_v25, %v487_v13 }
  0xc4   : > { %v460_v28 = vadd.f32 %v459_v26, %v458_v24  ;;  %v490_v29 = vrot.slane %v489_v27, 4 }
  0xc6   : > { %v461_v30 = vrot.slane %v460_v28, 2  ;;  %v491_v31 = vadd.f32 %v490_v29, %v489_v27 }
  0xc8   : > { %v462_v32 = vadd.f32 %v461_v30, %v460_v28  ;;  %v492_v33 = vrot.slane %v491_v31, 2 }
  0xca   : > { %v463_v34 = vrot.slane %v462_v32, 1  ;;  %v493_v35 = vadd.f32 %v492_v33, %v491_v31 }
  0xcc   : > { %v464_v36 = vadd.f32 %v463_v34, %v462_v32  ;;  %v494_v37 = vrot.slane %v493_v35, 1 }
  0xce   : > { %466 = vst.msk [vmem:[%s241_s12] sm:$0x1] %vm465_vm3, %v464_v36  ;;  %v495_v38 = vadd.f32 %v494_v37, %v493_v35 }
  0xd0   : > { %496 = vst.msk [vmem:[%s241_s12 + $0x1] sm:$0x1] %vm465_vm3, %v495_v38 }
  0xd1   : > { %839 = shalt.err (!%p836_p5)
}
  0xd2   : > { %756 = dma.vmem_to_hbm [thread:$0]  (%p957_p4), %s523_s13, 32, %s525_s14, %s506_s18  }
  0xd3 PF: > { %p762_p6 = scmp.ge.s32.totalorder %s890_s20, 2  ;;  %s547_s6 = sand.u32 1, %s870_s15  }
  0xd4   : > { %s548_s7 = scalar_lea.sflag [#allocation3], %s547_s6 }
  0xd5   : > { %p759_p7 = pnand %p762_p6, %p964_p8 }
  0xd7   : > { %p760_p9 = pneg %p759_p7 }
  0xd9   : > { %865 = dma.done.wait (%p760_p9), %s548_s7, 32  }
  0xda   : > { %867 = vsyncadd (%p760_p9), %s548_s7, 4294967264  ;;  %s18_s20 = sadd.s32 1, %s890_s20   ;;  %s1095_s15 = smov %s874_s16 }
  0xdb   : > { %p15_p10 = scmp.ge.s32.totalorder %s18_s20, 4   ;;  %s1096_s16 = smov %s878_s17 }
  0xdc   : > { %s1097_s17 = smov %s970_s28  ;;  %s1098_s18 = smov %s886_s19 }
  0xdd   : > { %s1099_s19 = smov %s1101_s23  ;;  %17 = sbr.rel (!%p15_p10) target bundleno = 4 (0x4), region = 86 }
  0xe2   :  { %554 = vsyncpa [#allocation3], 1 }
  0xe3   :  { %556 = vsyncpa [#allocation3 + $0x1], 1 }

// kernel: tile.18
= control target key start
LH: loop header
LB: loop body
LE: loop exit
PB: predicated region body
PF: predicated region fallthrough
CT: control target
= control target key end

     0   :  { %s22_s0 = inlined_call_operand.vmem [shape: f32[16], index: 0, kind: input, shape index: {}]   ;;  %s23_s1 = inlined_call_operand.vmem [shape: f32[4,16], index: 1, kind: output, shape index: {}]  }
   0x1   :  { %v4_v0 = vld [vmem:[%s22_s0] ss:$0 sm:$0xff] }
   0x2   :  { %5 = vst [vmem:[%s23_s1] sm:$0xf] %v4_v0 }

// kernel: tile.23
= control target key start
LH: loop header
LB: loop body
LE: loop exit
PB: predicated region body
PF: predicated region fallthrough
CT: control target
= control target key end

     0   :  { %s22_s0 = inlined_call_operand.vmem [shape: f32[8], index: 0, kind: input, shape index: {}]   ;;  %s23_s1 = inlined_call_operand.vmem [shape: f32[4,8], index: 1, kind: output, shape index: {}]  }
   0x1   :  { %v4_v0 = vld [vmem:[%s22_s0] ss:$0 sm:$0xff] }
   0x2   :  { %5 = vst [vmem:[%s23_s1] sm:$0xf] %v4_v0 }

// kernel: tile.28
= control target key start
LH: loop header
LB: loop body
LE: loop exit
PB: predicated region body
PF: predicated region fallthrough
CT: control target
= control target key end

     0   :  { %s22_s0 = inlined_call_operand.vmem [shape: f32[4], index: 0, kind: input, shape index: {}]   ;;  %s23_s1 = inlined_call_operand.vmem [shape: f32[4,4], index: 1, kind: output, shape index: {}]  }
   0x1   :  { %v4_v0 = vld [vmem:[%s22_s0] ss:$0 sm:$0xff] }
   0x2   :  { %5 = vst [vmem:[%s23_s1] sm:$0xf] %v4_v0 }

// kernel: tile.29
= control target key start
LH: loop header
LB: loop body
LE: loop exit
PB: predicated region body
PF: predicated region fallthrough
CT: control target
= control target key end

     0   :  { %s37_s8 = smov 4   ;;  %s38_s9 = smov 8   ;;  %vm7_vm0 = vcmask 31744   ;;  %vm13_vm1 = vcmask 130144   ;;  %vm19_vm2 = vcmask 97344   ;;  %vm25_vm3 = vcmask 64544   ;;  %s55_s0 = inlined_call_operand.vmem [shape: f32[4,4], index: 0, kind: input, shape index: {}]   ;;  %s56_s1 = inlined_call_operand.vmem [shape: f32[1,16], index: 1, kind: output, shape index: {}]  }
   0x1   :  { %v4_v0 = vld [vmem:[%s55_s0] sm:$0xf]  ;;  %s36_s0 = smov 12  }
   0x2   :  { %5 = vst [vmem:[#allocation1] sm:$0xf] %v4_v0 }
   0x9   :  { %v10_v1 = vld [vmem:[#allocation1 + $0x3] sm:$0x1]   ;;  %v22_v2 = vld [vmem:[#allocation1 + $0x1] sm:$0x1]   ;;  %v16_v3 = vld [vmem:[#allocation1 + $0x2] sm:$0x1]  }
   0xa   :  { %11 = vrot.lane.b32.xlu0 %v10_v1, %s36_s0  ;;  %23 = vrot.lane.b32.xlu1 %v22_v2, %s37_s8  ;;  %v6_v4 = vld [vmem:[#allocation1] sm:$0x1]  }
   0xb   :  { %8 = vst.msk [vmem:[#allocation0] sm:$0x1] %vm7_vm0, %v6_v4  }
  0x12   :  { %17 = vrot.lane.b32.xlu0 %v16_v3, %s38_s9 }
  0x7c   :  { %v12_v5 = vpop.permute.xlu0 %11   ;;  %v24_v6 = vpop.permute.xlu1 %23  }
  0x7d   :  { %14 = vst.msk [vmem:[#allocation0] sm:$0x1] %vm13_vm1, %v12_v5  }
  0x84   :  { %v18_v7 = vpop.permute.xlu0 %17  }
  0x85   :  { %20 = vst.msk [vmem:[#allocation0] sm:$0x1] %vm19_vm2, %v18_v7  }
  0x86   :  { %26 = vst.msk [vmem:[#allocation0] sm:$0x1] %vm25_vm3, %v24_v6  }
  0x8d   :  { %v29_v8 = vld [vmem:[#allocation0] sm:$0x1] }
  0x8e   :  { %32 = vst [vmem:[%s56_s1] sm:$0x1] %v29_v8 }

// kernel: cur_unet_block.3
= control target key start
LH: loop header
LB: loop body
LE: loop exit
PB: predicated region body
PF: predicated region fallthrough
CT: control target
= control target key end

     0   :  { %10 = vsyncpa [#allocation3], 0  ;;  %s1266_s0 = inlined_call_operand.vmem [shape: bf16[2,90,32], index: 0, kind: input, shape index: {}]   ;;  %s1267_s1 = inlined_call_operand.vmem [shape: bf16[2,32,16], index: 1, kind: input, shape index: {}]   ;;  %s1268_s2 = inlined_call_operand.vmem [shape: f32[1,16], index: 2, kind: input, shape index: {}]   ;;  %s1269_s3 = inlined_call_operand.vmem [shape: f32[2,81,16], index: 3, kind: output, shape index: {0}]   ;;  %s1270_s4 = inlined_call_operand.hbm [shape: f32[2,2,16], index: 4, kind: output, shape index: {1}]  }
   0x1   :  { %12 = vsyncpa [#allocation3 + $0x1], 0  ;;  %s1037_s15 = smov 0   ;;  %s1039_s16 = smov 0  }
   0x2   :  { %s1041_s17 = smov 0   ;;  %s1043_s18 = smov 0  }
   0x3   :  { %s1045_s19 = smov 0   ;;  %s1047_s20 = smov 0  }
   0x4 LB: > { %s761_s21 = sadd.s32 4294967295, %s1010_s20   ;;  %s762_s22 = sadd.s32 4294967294, %s1010_s20   ;;  %s1010_s20 = sphi %s1047_s20, %s18_s20   ;;  %s1006_s19 = sphi %s1045_s19, %s1277_s19   ;;  %s1002_s18 = sphi %s1043_s18, %s1276_s18   ;;  %s998_s17 = sphi %s1041_s17, %s1275_s17   ;;  %s994_s16 = sphi %s1039_s16, %s1274_s16   ;;  %s990_s15 = sphi %s1037_s15, %s1273_s15  }
   0x5   : > { %s30_s23 = sadd.s32 1, %s1006_s19  ;;  %s145_s24 = sadd.s32 1, %s998_s17 }
   0x6   : > { %p32_p0 = scmp.ge.s32.totalorder %s30_s23, 2  ;;  %p155_p1 = scmp.ne.s32.totalorder %s998_s17, %s994_s16 }
   0x7   : > { %p156_p2 = scmp.eq.s32.totalorder %s761_s21, 1  ;;  %p161_p3 = scmp.ne.s32.totalorder %s994_s16, %s990_s15 }
   0x8   : > { %s1279_s23 = smov (%p32_p0, %s30_s23), 0  ;;  %p162_p5 = scmp.eq.s32.totalorder %s762_s22, 1 }
   0x9   : > { %p1077_p4 = por %p156_p2, %p155_p1  ;;  %s140_s26 = ssub.s32 %s1006_s19, %s1279_s23 }
   0xa   : > { %p767_p6 = scmp.ge.s32.totalorder %s1010_s20, 1  ;;  %p143_p7 = scmp.eq.s32.totalorder %s140_s26, 0 }
   0xb   : > { %p1084_p8 = por %p162_p5, %p161_p3  ;;  %p201_p9 = scmp.lt.s32.totalorder %s1010_s20, 3 }
   0xc   : > { %s1090_s28 = scalar_select %p143_p7, %s998_s17, %s145_s24  }
   0xd   : > { %p202_p10 = pnand %p767_p6, %p201_p9 }
   0xe   : > { %p242_p11 = scmp.lt.s32.totalorder (!%p202_p10), %s1002_s18, 1  ;;  %s239_s6 = sand.u32 (!%p202_p10), 1, %s994_s16  }
   0xf   : > { %205 = sbr.rel (%p202_p10) target bundleno = 234 (0xea), region = 32  ;;  %s768_s7 = sshll.u32 (!%p202_p10), %s239_s6, 1 }
  0x10   : > { %s804_s8 = sshll.u32 (!%p202_p10), %s1002_s18, 1  ;;  %s952_s29 = scalar_lea.hbm (!%p202_p10), %s1270_s4, 4 }
  0x11   : > { %s625_s11 = scalar_lea.hbm (!%p202_p10), %s1270_s4, %s804_s8 }
  0x12   : > { %s629_s14 = sshll.u32 (!%p202_p10), %s625_s11, 4  ;;  %s630_s14 = int_to_ptr.hbm [resolvable:$true] %s629_s14 }
  0x14   : > { %v808_v0 = vld [vmem:[%s1267_s1 + $0x8] sm:$0xff]  ;;  %v810_v1 = vld [vmem:[%s1267_s1 + $0x18] sm:$0xff]  ;;  %v807_v2 = vld [vmem:[%s1267_s1] sm:$0xff]  ;;  %s1103_s9 = scalar_select %p242_p11, %s1002_s18, 1  ;;  %vm372_vm0 = vcmask 261120   ;;  %vm522_vm2 = vcmask 130048  }
  0x15   : > { %475 = vmatpush.bf16.msra.mxu1 %v808_v0  ;;  %397 = vmatpush.bf16.msra.mxu0 %v810_v1  ;;  %v809_v3 = vld [vmem:[%s1267_s1 + $0x10] sm:$0xff]  ;;  %vm313_vm1 = vsmask.f32 7424  ;;  %v1147_v49 = vld [vmem:[%s1268_s2] ss:$0 sm:$0xff]  ;;  %vm533_vm3 = vcmask 122880  }
  0x16   : > { %860 = vmatpush.bf16.msra.mxu2 %v810_v1  ;;  %862 = vmatpush.bf16.msra.mxu3 %v808_v0  ;;  %s874_s12 = smul.u32 48, %s1103_s9  ;;  %s611_s18 = scalar_lea.sflag [#allocation3], %s239_s6 }
  0x17   : > { %s875_s22 = smul.u32 88, %s1103_s9 }
  0x18   : > { %s1112_s21 = scalar_lea.vmem %s1266_s0, %s874_s12  ;;  %s241_s12 = scalar_lea.vmem [#allocation2], %s768_s7 }
  0x19   : > { %476 = vmatpush.bf16.msra.mxu1 %v807_v2  ;;  %398 = vmatpush.bf16.msra.mxu0 %v809_v3  ;;  %v812_v4 = vld [vmem:[%s1112_s21] sm:$0xff]   ;;  %v868_v6 = vld [vmem:[%s1112_s21 + $0xc] sm:$0xff]   ;;  %v833_v9 = vld [vmem:[%s1112_s21 + $0x18] sm:$0xff]   ;;  %s1152_s5 = scalar_lea.vmem %s1269_s3, %s875_s22  ;;  %s627_s13 = sshll.u32 %s241_s12, 4  ;;  %s628_s13 = int_to_ptr.vmem [resolvable:$true] %s627_s13 }
  0x1a   : > { %v866_v5 = vld [vmem:[%s1112_s21 + $0x4] sm:$0xff]   ;;  %861 = vmatpush.bf16.msra.mxu2 %v809_v3  ;;  %863 = vmatpush.bf16.msra.mxu3 %v807_v2  ;;  %v872_v7 = vld [vmem:[%s1112_s21 + $0x1c] sm:$0xff]   ;;  %v322_v12 = vshll.u32 %v868_v6, 16  ;;  %v275_v18 = vld [vmem:[%s1112_s21 + $0x2c] sm:$0x1]  ;;  %v326_v28 = vshrl.u32 %v868_v6, 16 }
  0x1b   : > { %v873_v8 = vld [vmem:[%s1112_s21 + $0x24] sm:$0xff]  ;;  %v315_v10 = vshrl.u32 %v866_v5, 16  ;;  %v317_v11 = vshll.u32 %v866_v5, 16  ;;  %v338_v13 = vshll.u32 %v872_v7, 16  ;;  %v342_v14 = vshrl.u32 %v872_v7, 16  ;;  %v870_v26 = vld [vmem:[%s1112_s21 + $0x14] sm:$0xff]  }
  0x1c   : > { %797 = vmatmul.msk.bf16.vlgmr.msra.gmra.mxu1 %vm372_vm0, %v812_v4  ;;  %v346_v15 = vshll.u32 %v873_v8, 16  ;;  %v324_v17 = vrot.slane %v322_v12, 1  ;;  %v306_v23 = vunpack.c.l.b16 %v275_v18  ;;  %v330_v29 = vshll.u32 %v870_v26, 16  ;;  %v831_v30 = vld [vmem:[%s1112_s21 + $0x8] sm:$0xff]   ;;  %v834_v33 = vld [vmem:[%s1112_s21 + $0x20] sm:$0xff]   ;;  %v832_v43 = vld [vmem:[%s1112_s21 + $0x10] sm:$0xff]  }
  0x1d   : > { %800 = vmatmul.msk.bf16.vlgmr.msra.gmra.mxu3 %vm372_vm0, %v833_v9  ;;  %v319_v16 = vrot.slane %v317_v11, 1  ;;  %v340_v19 = vrot.slane %v338_v13, 1  ;;  %v350_v31 = vshrl.u32 %v873_v8, 16  ;;  %v273_v40 = vld [vmem:[%s1112_s21 + $0x28] sm:$0x1]  ;;  %v334_v42 = vshrl.u32 %v870_v26, 16 }
  0x1e   : > { %v348_v20 = vrot.slane %v346_v15, 1  ;;  %v312_v27 = vpack.c.b16 %v306_v23, %v306_v23  ;;  %v328_v34 = vor.u32 %v326_v28, %v324_v17  ;;  %v332_v35 = vrot.slane %v330_v29, 1  ;;  %s946_s21 = sshra.s32 %s630_s14, 4  ;;  %s947_s21 = int_to_ptr.hbm [resolvable:$true] %s946_s21 }
  0x1f   : > { %v320_v21 = vor.u32 %v319_v16, %v315_v10  ;;  %v344_v22 = vor.u32 %v342_v14, %v340_v19  ;;  %v432_v41 = vunpack.c.l.b16 %v273_v40  ;;  %s948_s22 = scalar_lea.hbm %s947_s21, 2  ;;  %p953_p1 = scmp.lt.s32.totalorder %s947_s21, %s1270_s4 }
  0x20   : > { %v354_v32 = vshll.u32 %v312_v27, 16  ;;  %v352_v36 = vor.u32 %v350_v31, %v348_v20  ;;  %v333_v38 = vsel %vm313_vm1, %v328_v34, %v332_v35  ;;  %v336_v45 = vor.u32 %v334_v42, %v332_v35  ;;  %p949_p12 = scmp.ne.s32.totalorder %s947_s21, %s948_s22  ;;  %p954_p2 = scmp.lt.s32.totalorder %s952_s29, %s948_s22 }
  0x21   : > { %v325_v24 = vsel %vm313_vm1, %v320_v21, %v324_v17  ;;  %v349_v25 = vsel %vm313_vm1, %v344_v22, %v348_v20  ;;  %v438_v44 = vpack.c.b16 %v432_v41, %v432_v41  ;;  %v358_v47 = vshrl.u32 %v312_v27, 16 }
  0x22   : > { %783 = vmatmul.msk.bf16.vlgmr.msra.gmra.mxu0 %vm372_vm0, %v325_v24  ;;  %786 = vmatmul.msk.bf16.vlgmr.msra.gmra.mxu2 %vm372_vm0, %v349_v25  ;;  %v356_v37 = vrot.slane %v354_v32, 1  ;;  %v341_v46 = vsel %vm313_vm1, %v336_v45, %v340_v19  ;;  %p950_p13 = pnand %p949_p12, %p1077_p4  ;;  %p955_p3 = por %p954_p2, %p953_p1 }
  0x24   : > { %v357_v39 = vsel %vm313_vm1, %v352_v36, %v356_v37  ;;  %p951_p0 = pneg %p950_p13 }
  0x26   : > { %p956_p5 = pnand %p955_p3, %p951_p0 }
  0x2c   : > { %798 = vmatmul.msk.bf16.gmra.mxu1 %vm372_vm0, %v831_v30 }
  0x2d   : > { %801 = vmatmul.msk.bf16.gmra.mxu3 %vm372_vm0, %v834_v33 }
  0x32   : > { %784 = vmatmul.msk.bf16.gmra.mxu0 %vm372_vm0, %v333_v38  ;;  %787 = vmatmul.msk.bf16.gmra.mxu2 %vm372_vm0, %v357_v39 }
  0x3c   : > { %799 = vmatmul.msk.bf16.gmra.mxu1 %vm372_vm0, %v832_v43 }
  0x3d   : > { %802 = vmatmul.msk.bf16.gmra.mxu3 %vm372_vm0, %v438_v44 }
  0x42   : > { %785 = vmatmul.msk.bf16.gmra.mxu0 %vm372_vm0, %v341_v46  ;;  %788 = vmatmul.msk.bf16.gmra.mxu2 %vm372_vm0, %v358_v47 }
  0x99   : > { %v478_v48 = vpop.f32.mrf.mxu1 }
  0x9f   : > { %v400_v50 = vpop.f32.mrf.mxu0 }
  0xa0   : > { %v493_v51 = vpop.f32.mrf.mxu3  ;;  %v479_v52 = vadd.f32 %v478_v48, %v400_v50 }
  0xa1   : > { %v480_v53 = vpop.f32.mrf.mxu1 }
  0xa2   : > { %v511_v54 = vadd.f32 %v1147_v49, %v479_v52 }
  0xa4   : > { %523 = vst.msk [vmem:[%s1152_s5] sm:$0xff] %vm522_vm2, %v511_v54  ;;  %v563_v22 = vmul.f32 %v511_v54, %v511_v54  ;;  %v535_v26 = vsel %vm522_vm2, %v511_v54, 0.0 }
  0xa5   : > { %v415_v55 = vpop.f32.mrf.mxu2 }
  0xa6   : > { %v494_v57 = vadd.f32 %v493_v51, %v415_v55  ;;  %v574_v31 = vsel %vm522_vm2, %v563_v22, 0.0 }
  0xa7   : > { %v402_v56 = vpop.f32.mrf.mxu0 }
  0xa8   : > { %v495_v58 = vpop.f32.mrf.mxu3  ;;  %v481_v59 = vadd.f32 %v480_v53, %v402_v56  ;;  %v1158_v61 = vadd.f32 %v1147_v49, %v494_v57 }
  0xa9   : > { %v483_v60 = vpop.f32.mrf.mxu1 }
  0xaa   : > { %v512_v62 = vadd.f32 %v1147_v49, %v481_v59  ;;  %529 = vst.msk [vmem:[%s1152_s5 + $0x30] sm:$0xff] %vm522_vm2, %v1158_v61  ;;  %v569_v53 = vmul.f32 %v1158_v61, %v1158_v61 }
  0xac   : > { %524 = vst.msk [vmem:[%s1152_s5 + $0x8] sm:$0xff] %vm522_vm2, %v512_v62  ;;  %v564_v19 = vmul.f32 %v512_v62, %v512_v62  ;;  %v536_v23 = vsel %vm522_vm2, %v512_v62, 0.0 }
  0xad   : > { %v417_v63 = vpop.f32.mrf.mxu2  ;;  %v537_v30 = vadd.f32 %v536_v23, %v535_v26 }
  0xae   : > { %v496_v1 = vadd.f32 %v495_v58, %v417_v63  ;;  %v575_v27 = vsel %vm522_vm2, %v564_v19, 0.0  ;;  %v546_v58 = vsel %vm522_vm2, %v1158_v61, 0.0 }
  0xaf   : > { %v405_v0 = vpop.f32.mrf.mxu0  ;;  %v576_v37 = vadd.f32 %v575_v27, %v574_v31 }
  0xb0   : > { %v498_v2 = vpop.f32.mrf.mxu3  ;;  %v484_v3 = vadd.f32 %v483_v60, %v405_v0  ;;  %v1167_v4 = vadd.f32 %v1147_v49, %v496_v1  ;;  %v585_v0 = vsel %vm522_vm2, %v569_v53, 0.0 }
  0xb1   : > { %v485_v6 = vpop.f32.mrf.mxu1 }
  0xb2   : > { %v513_v5 = vadd.f32 %v1147_v49, %v484_v3  ;;  %530 = vst.msk [vmem:[%s1152_s5 + $0x38] sm:$0xff] %vm522_vm2, %v1167_v4  ;;  %v548_v1 = vsel %vm522_vm2, %v1167_v4, 0.0 }
  0xb4   : > { %525 = vst.msk [vmem:[%s1152_s5 + $0x10] sm:$0xff] %vm522_vm2, %v513_v5  ;;  %v565_v24 = vmul.f32 %v513_v5, %v513_v5  ;;  %v538_v28 = vsel %vm522_vm2, %v513_v5, 0.0 }
  0xb5   : > { %v420_v7 = vpop.f32.mrf.mxu2  ;;  %v539_v38 = vadd.f32 %v538_v28, %v537_v30 }
  0xb6   : > { %v499_v9 = vadd.f32 %v498_v2, %v420_v7  ;;  %v577_v32 = vsel %vm522_vm2, %v565_v24, 0.0 }
  0xb7   : > { %v407_v8 = vpop.f32.mrf.mxu0  ;;  %v578_v45 = vadd.f32 %v577_v32, %v576_v37 }
  0xb8   : > { %v500_v10 = vpop.f32.mrf.mxu3  ;;  %v486_v11 = vadd.f32 %v485_v6, %v407_v8  ;;  %v1176_v12 = vadd.f32 %v1147_v49, %v499_v9 }
  0xb9   : > { %v488_v14 = vpop.f32.mrf.mxu1 }
  0xba   : > { %v514_v13 = vadd.f32 %v1147_v49, %v486_v11  ;;  %531 = vst.msk [vmem:[%s1152_s5 + $0x40] sm:$0xff] %vm522_vm2, %v1176_v12  ;;  %v571_v2 = vmul.f32 %v1176_v12, %v1176_v12  ;;  %v550_v6 = vsel %vm522_vm2, %v1176_v12, 0.0 }
  0xbc   : > { %526 = vst.msk [vmem:[%s1152_s5 + $0x18] sm:$0xff] %vm522_vm2, %v514_v13  ;;  %v566_v29 = vmul.f32 %v514_v13, %v514_v13  ;;  %v540_v33 = vsel %vm522_vm2, %v514_v13, 0.0  ;;  %v589_v11 = vsel %vm522_vm2, %v571_v2, 0.0 }
  0xbd   : > { %v422_v15 = vpop.f32.mrf.mxu2  ;;  %v541_v46 = vadd.f32 %v540_v33, %v539_v38 }
  0xbe   : > { %v501_v17 = vadd.f32 %v500_v10, %v422_v15  ;;  %v579_v42 = vsel %vm522_vm2, %v566_v29, 0.0 }
  0xbf   : > { %v410_v16 = vpop.f32.mrf.mxu0  ;;  %v580_v51 = vadd.f32 %v579_v42, %v578_v45 }
  0xc0   : > { %v503_v18 = vpop.f32.mrf.mxu3  ;;  %v489_v20 = vadd.f32 %v488_v14, %v410_v16  ;;  %v520_v21 = vadd.f32 %v1147_v49, %v501_v17 }
  0xc1   : > { %v490_v35 = vpop.f32.mrf.mxu1 }
  0xc2   : > { %v515_v25 = vadd.f32 %v1147_v49, %v489_v20  ;;  %532 = vst.msk [vmem:[%s1152_s5 + $0x48] sm:$0xff] %vm522_vm2, %v520_v21  ;;  %v572_v7 = vmul.f32 %v520_v21, %v520_v21 }
  0xc4   : > { %527 = vst.msk [vmem:[%s1152_s5 + $0x20] sm:$0xff] %vm522_vm2, %v515_v25  ;;  %v567_v34 = vmul.f32 %v515_v25, %v515_v25  ;;  %v542_v43 = vsel %vm522_vm2, %v515_v25, 0.0  ;;  %v591_v16 = vsel %vm522_vm2, %v572_v7, 0.0 }
  0xc5   : > { %v425_v36 = vpop.f32.mrf.mxu2  ;;  %v543_v52 = vadd.f32 %v542_v43, %v541_v46 }
  0xc6   : > { %v504_v40 = vadd.f32 %v503_v18, %v425_v36  ;;  %v581_v48 = vsel %vm522_vm2, %v567_v34, 0.0 }
  0xc7   : > { %v412_v39 = vpop.f32.mrf.mxu0  ;;  %v582_v56 = vadd.f32 %v581_v48, %v580_v51 }
  0xc8   : > { %v505_v41 = vpop.f32.mrf.mxu3  ;;  %v491_v44 = vadd.f32 %v490_v35, %v412_v39  ;;  %v521_v47 = vadd.f32 %v1147_v49, %v504_v40 }
  0xca   : > { %v516_v50 = vadd.f32 %v1147_v49, %v491_v44  ;;  %534 = vst.msk [vmem:[%s1152_s5 + $0x50] sm:$0x1] %vm533_vm3, %v521_v47  ;;  %v570_v49 = vmul.f32 %v1167_v4, %v1167_v4  ;;  %v573_v8 = vmul.f32 %v521_v47, %v521_v47  ;;  %v552_v4 = vsel %vm522_vm2, %v520_v21, 0.0 }
  0xcb   : > { %v554_v13 = vsel %vm533_vm3, %v521_v47, 0.0 }
  0xcc   : > { %528 = vst.msk [vmem:[%s1152_s5 + $0x28] sm:$0xff] %vm522_vm2, %v516_v50  ;;  %v544_v54 = vsel %vm522_vm2, %v516_v50, 0.0  ;;  %v568_v55 = vmul.f32 %v516_v50, %v516_v50  ;;  %v587_v61 = vsel %vm522_vm2, %v570_v49, 0.0  ;;  %v593_v17 = vsel %vm533_vm3, %v573_v8, 0.0 }
  0xcd   : > { %v545_v57 = vadd.f32 %v544_v54, %v543_v52  ;;  %v427_v60 = vpop.f32.mrf.mxu2 }
  0xce   : > { %v583_v59 = vsel %vm522_vm2, %v568_v55, 0.0 }
  0xcf   : > { %v547_v62 = vadd.f32 %v546_v58, %v545_v57  ;;  %v584_v63 = vadd.f32 %v583_v59, %v582_v56 }
  0xd1   : > { %v549_v3 = vadd.f32 %v548_v1, %v547_v62  ;;  %v586_v5 = vadd.f32 %v585_v0, %v584_v63 }
  0xd3   : > { %v588_v9 = vadd.f32 %v587_v61, %v586_v5  ;;  %v551_v10 = vadd.f32 %v550_v6, %v549_v3 }
  0xd5   : > { %v553_v14 = vadd.f32 %v552_v4, %v551_v10  ;;  %v590_v15 = vadd.f32 %v589_v11, %v588_v9 }
  0xd7   : > { %v555_v18 = vadd.f32 %v554_v13, %v553_v14  ;;  %v592_v12 = vadd.f32 %v591_v16, %v590_v15 }
  0xd9   : > { %v556_v19 = vrot.slane %v555_v18, 4  ;;  %v594_v20 = vadd.f32 %v593_v17, %v592_v12 }
  0xdb   : > { %v557_v22 = vadd.f32 %v556_v19, %v555_v18  ;;  %v595_v23 = vrot.slane %v594_v20, 4 }
  0xdd   : > { %v558_v24 = vrot.slane %v557_v22, 2  ;;  %v596_v25 = vadd.f32 %v595_v23, %v594_v20 }
  0xdf   : > { %v559_v21 = vadd.f32 %v558_v24, %v557_v22  ;;  %v597_v26 = vrot.slane %v596_v25, 2 }
  0xe1   : > { %v560_v27 = vrot.slane %v559_v21, 1  ;;  %v598_v28 = vadd.f32 %v597_v26, %v596_v25 }
  0xe3   : > { %v561_v29 = vadd.f32 %v560_v27, %v559_v21  ;;  %v599_v30 = vrot.slane %v598_v28, 1 }
  0xe5   : > { %562 = vst.msk [vmem:[%s241_s12] sm:$0x1] %vm533_vm3, %v561_v29  ;;  %v600_v31 = vadd.f32 %v599_v30, %v598_v28 }
  0xe7   : > { %601 = vst.msk [vmem:[%s241_s12 + $0x1] sm:$0x1] %vm533_vm3, %v600_v31 }
  0xe8   : > { %959 = shalt.err (!%p956_p5)
}
  0xe9   : > { %876 = dma.vmem_to_hbm [thread:$0]  (%p1077_p4), %s628_s13, 32, %s630_s14, %s611_s18  }
  0xea PF: > { %p882_p6 = scmp.ge.s32.totalorder %s1010_s20, 2  ;;  %s652_s6 = sand.u32 1, %s990_s15  }
  0xeb   : > { %s653_s7 = scalar_lea.sflag [#allocation3], %s652_s6 }
  0xec   : > { %p879_p7 = pnand %p882_p6, %p1084_p8 }
  0xee   : > { %p880_p9 = pneg %p879_p7 }
  0xf0   : > { %985 = dma.done.wait (%p880_p9), %s653_s7, 32  }
  0xf1   : > { %987 = vsyncadd (%p880_p9), %s653_s7, 4294967264  ;;  %s18_s20 = sadd.s32 1, %s1010_s20   ;;  %s1273_s15 = smov %s994_s16 }
  0xf2   : > { %p15_p10 = scmp.ge.s32.totalorder %s18_s20, 4   ;;  %s1274_s16 = smov %s998_s17 }
  0xf3   : > { %s1275_s17 = smov %s1090_s28  ;;  %s1276_s18 = smov %s1006_s19 }
  0xf4   : > { %s1277_s19 = smov %s1279_s23  ;;  %17 = sbr.rel (!%p15_p10) target bundleno = 4 (0x4), region = 86 }
  0xf9   :  { %659 = vsyncpa [#allocation3], 1 }
  0xfa   :  { %661 = vsyncpa [#allocation3 + $0x1], 1 }

</bundles_post_ra>
